<compile_context>
chip_gen: v7x
topology: tpu7x:2x2x1
jax: 0.10.0
libtpu: 0.0.40
codegen_flags: <defaults>
</compile_context>

<pallas_src>
import jax
import jax.numpy as jnp
from jax.experimental import pallas as pl
from jax.experimental.pallas import tpu as pltpu


def linear_kernel(x_ref, w_ref, b_ref, o_ref):
    # x_ref: (B, IN), w_ref: (OUT, IN), b_ref: (B, OUT), o_ref: (B, OUT)
    # Contract x dim 1 with w dim 1 (PyTorch F.linear: y = x @ W.T), f32 acc.
    y = jax.lax.dot_general(
        x_ref[...],
        w_ref[...],
        dimension_numbers=(((1,), (1,)), ((), ())),
        preferred_element_type=jnp.float32,
    )
    o_ref[...] = (y + b_ref[...]).astype(o_ref.dtype)


def make_linear_pallas(weight, bias, batch):
    """Build a jitted forward for y = x @ W.T + b.

    weight: (OUT, IN), bias: (OUT,). Parameters are captured as constants under
    jit; the bias is broadcast once at build time so the kernel epilogue is a
    plain element-wise add.
    """
    out_f, in_f = weight.shape
    assert bias.shape == (out_f,)

    # Build-time (one-off) broadcast of the bias to the output tile shape.
    bias_b = jnp.broadcast_to(bias.reshape(1, out_f), (batch, out_f))

    flops = 2 * batch * in_f * out_f
    bytes_accessed = (batch * in_f + out_f * in_f + batch * out_f + batch * out_f) * 4

    call = pl.pallas_call(
        linear_kernel,
        out_shape=jax.ShapeDtypeStruct((batch, out_f), weight.dtype),
        # No grid: everything fits trivially in VMEM for the single invocation,
        # so there is no per-step pipeline overhead and no wrapper pad/slice.
        in_specs=[
            pl.BlockSpec(memory_space=pltpu.MemorySpace.VMEM),
            pl.BlockSpec(memory_space=pltpu.MemorySpace.VMEM),
            pl.BlockSpec(memory_space=pltpu.MemorySpace.VMEM),
        ],
        out_specs=pl.BlockSpec(memory_space=pltpu.MemorySpace.VMEM),
        cost_estimate=pl.CostEstimate(
            flops=flops, bytes_accessed=bytes_accessed, transcendentals=0
        ),
    )

    @jax.jit
    def forward(x):
        # Shapes are baked in at build time; fail loudly on mismatch.
        assert x.shape == (batch, in_f), (
            f"forward() built for x of shape {(batch, in_f)}, got {x.shape}"
        )
        return call(x, weight, bias_b)

    return forward


if __name__ == "__main__":
    key = jax.random.PRNGKey(0)
    kx, kw, kb = jax.random.split(key, 3)

    B, IN, OUT = 8, 10, 10
    # Deterministic params (mimics nn.Linear's uniform(-1/sqrt(IN), 1/sqrt(IN)) init)
    bound = 1.0 / jnp.sqrt(jnp.float32(IN))
    weight = jax.random.uniform(kw, (OUT, IN), jnp.float32, -bound, bound)
    bias = jax.random.uniform(kb, (OUT,), jnp.float32, -bound, bound)
    x = jax.random.normal(kx, (B, IN), jnp.float32)

    fwd = make_linear_pallas(weight, bias, B)
    y = fwd(x)
    jax.block_until_ready(y)

    # Reference: PyTorch F.linear semantics
    y_ref = x @ weight.T + bias
    assert y.shape == (B, OUT)
    assert jnp.allclose(y, y_ref, atol=1e-5, rtol=1e-5), "mismatch vs reference"

    print("KERNEL_OK")
</pallas_src>

<mosaic_0001>
module attributes {stable_mosaic.version = 11 : i64} {
  func.func @linear_kernel(%arg0: memref<8x10xf32, #tpu.memory_space<vmem>>, %arg1: memref<10x10xf32, #tpu.memory_space<vmem>>, %arg2: memref<8x10xf32, #tpu.memory_space<vmem>>, %arg3: memref<8x10xf32, #tpu.memory_space<vmem>>) attributes {dimension_semantics = [], scalar_prefetch = 0 : i64, scratch_operands = 0 : i64, tpu.core_type = #tpu.core_type<tc>} {
    %c0 = arith.constant 0 : index
    %c0_0 = arith.constant 0 : index
    %0 = vector.load %arg0[%c0, %c0_0] : memref<8x10xf32, #tpu.memory_space<vmem>>, vector<8x10xf32>
    %c0_1 = arith.constant 0 : index
    %c0_2 = arith.constant 0 : index
    %1 = vector.load %arg1[%c0_1, %c0_2] : memref<10x10xf32, #tpu.memory_space<vmem>>, vector<10x10xf32>
    %cst = arith.constant dense<0.000000e+00> : vector<8x10xf32>
    %2 = tpu.matmul %0, %1, %cst {dimension_numbers = #tpu.dot_dimension_numbers<[1], [1], [0], [0], [0, 0, 1, 0], [], []>} : vector<8x10xf32>, vector<10x10xf32>, vector<8x10xf32> -> vector<8x10xf32>
    %c0_3 = arith.constant 0 : index
    %c0_4 = arith.constant 0 : index
    %3 = vector.load %arg2[%c0_3, %c0_4] : memref<8x10xf32, #tpu.memory_space<vmem>>, vector<8x10xf32>
    %4 = arith.addf %2, %3 : vector<8x10xf32>
    %c0_5 = arith.constant 0 : index
    %c0_6 = arith.constant 0 : index
    %5 = vector.load %arg3[%c0_5, %c0_6] : memref<8x10xf32, #tpu.memory_space<vmem>>, vector<8x10xf32>
    tpu.vector_store %arg3[%c0_5, %c0_6], %4 {strides = array<i32>} : memref<8x10xf32, #tpu.memory_space<vmem>>, vector<8x10xf32>,
    return
  }
}

</mosaic_0001>

<bundles_post_ra>
// kernel: forward.1
= control target key start
LH: loop header
LB: loop body
LE: loop exit
PB: predicated region body
PF: predicated region fallthrough
CT: control target
= control target key end

     0   :  { %8 = vsyncpa [#allocation3], 0  ;;  %s350_s0 = inlined_call_operand.hbm [shape: f32[8,10], index: 0, kind: input, shape index: {}]   ;;  %s351_s1 = inlined_call_operand.hbm [shape: f32[10,10], index: 1, kind: input, shape index: {}]   ;;  %s352_s2 = inlined_call_operand.hbm [shape: f32[8,10], index: 2, kind: input, shape index: {}]   ;;  %s353_s3 = inlined_call_operand.hbm [shape: f32[8,10], index: 3, kind: output, shape index: {}]  }
   0x1   :  { %9 = vsyncpa [#allocation6], 0 }
   0x2   :  { %10 = vsyncpa [#allocation4], 0  ;;  %s273_s12 = smov [#allocation5]   ;;  %s179_s16 = scalar_lea.hbm %s351_s1, 256 }
   0x3   :  { %s26_s13 = sshll.u32 %s273_s12, 4  ;;  %p180_p0 = scmp.ne.s32.totalorder %s351_s1, %s179_s16  ;;  %s27_s13 = int_to_ptr.vmem [resolvable:$true] %s26_s13 }
   0x4   :  { %p183_p1 = scmp.lt.u32.totalorder %s179_s16, %s351_s1 }
   0x6   :  { %p185_p2 = pnand %p183_p1, %p180_p0 }
   0x8   :  { %188 = shalt.err (!%p185_p2)
}
   0x9   :  { %s189_s21 = scalar_lea.vmem %s27_s13, 256  ;;  %p194_p4 = scmp.lt.s32.totalorder %s27_s13, %s27_s13 }
   0xa   :  { %p190_p3 = scmp.ne.s32.totalorder %s27_s13, %s189_s21  ;;  %p195_p5 = scmp.lt.s32.totalorder %s189_s21, %s189_s21 }
   0xc   :  { %p196_p6 = por %p195_p5, %p194_p4 }
   0xe   :  { %p197_p7 = pnand %p196_p6, %p190_p3 }
  0x10   :  { %200 = shalt.err (!%p197_p7)
}
  0x11   :  { %s274_s22 = smov 128   ;;  %s275_s23 = smov 8  }
  0x12   :  { %32 = dma.hbm_to_vmem [thread:$0]  %s351_s1, 256, %s27_s13, [#allocation6], %s274_s22, %s274_s22, %s275_s23  }
  0x13   :  { %s276_s26 = smov [#allocation2]   ;;  %s277_s28 = smov [#allocation7]  }
  0x14   :  { %s17_s27 = sshll.u32 %s276_s26, 4  ;;  %s39_s29 = sshll.u32 %s277_s28, 4  ;;  %s18_s27 = int_to_ptr.vmem [resolvable:$true] %s17_s27  ;;  %s40_s29 = int_to_ptr.vmem [resolvable:$true] %s39_s29 }
  0x15   :  { %s201_s5 = scalar_lea.hbm %s350_s0, 128 }
  0x16   :  { %p202_p8 = scmp.ne.s32.totalorder %s350_s0, %s201_s5  ;;  %p205_p9 = scmp.lt.u32.totalorder %s201_s5, %s350_s0 }
  0x18   :  { %p207_p10 = pnand %p205_p9, %p202_p8 }
  0x1a   :  { %210 = shalt.err (!%p207_p10)
}
  0x1b   :  { %s211_s1 = scalar_lea.vmem %s18_s27, 128  ;;  %p216_p12 = scmp.lt.s32.totalorder %s18_s27, %s18_s27 }
  0x1c   :  { %p212_p11 = scmp.ne.s32.totalorder %s18_s27, %s211_s1  ;;  %p217_p13 = scmp.lt.s32.totalorder %s211_s1, %s211_s1 }
  0x1e   :  { %p218_p0 = por %p217_p13, %p216_p12 }
  0x20   :  { %p219_p1 = pnand %p218_p0, %p212_p11 }
  0x22   :  { %222 = shalt.err (!%p219_p1)
}
  0x23   :  { %20 = dma.hbm_to_vmem [thread:$0]  %s350_s0, 128, %s18_s27, [#allocation3]  }
  0x24   :  { %s223_s14 = scalar_lea.hbm %s352_s2, 128 }
  0x25   :  { %p224_p2 = scmp.ne.s32.totalorder %s352_s2, %s223_s14  ;;  %p227_p3 = scmp.lt.u32.totalorder %s223_s14, %s352_s2 }
  0x27   :  { %p229_p4 = pnand %p227_p3, %p224_p2 }
  0x29   :  { %232 = shalt.err (!%p229_p4)
}
  0x2a   :  { %s233_s19 = scalar_lea.vmem %s40_s29, 128  ;;  %p238_p6 = scmp.lt.s32.totalorder %s40_s29, %s40_s29 }
  0x2b   :  { %p234_p5 = scmp.ne.s32.totalorder %s40_s29, %s233_s19  ;;  %p239_p7 = scmp.lt.s32.totalorder %s233_s19, %s233_s19 }
  0x2d   :  { %p240_p8 = por %p239_p7, %p238_p6 }
  0x2f   :  { %p241_p9 = pnand %p240_p8, %p234_p5 }
  0x31   :  { %244 = shalt.err (!%p241_p9)
}
  0x32   :  { %42 = dma.hbm_to_vmem [thread:$0]  %s352_s2, 128, %s40_s29, [#allocation6]  }
  0x33   :  { %267 = dma.done.wait [#allocation3], 128  }
  0x34   :  { %268 = vsyncadd [#allocation3], 4294967168 }
  0x35   :  { %269 = dma.done.wait [#allocation6], 384  }
  0x36   :  { %270 = vsyncadd [#allocation6], 4294966912  ;;  %v278_v0 = vmov 0.0|0.0   ;;  %vm279_vm0 = vmmov 0   ;;  %v280_v1 = vmov 0.0   ;;  %vm56_vm1 = vcmask 80896  }
  0x37   :  { %166 = vmatprep.subr.bf16.mxu0 %v278_v0  ;;  %163 = vmatprep.mubr.msk.f32.mxu0 %vm279_vm0, %v280_v1  ;;  %v53_v2 = vld [vmem:[#allocation5] sm:$0xff]  ;;  %v54_v3 = vld [vmem:[#allocation5 + $0x8] sm:$0x3]  ;;  %vm168_vm2 = vmpackc.low %vm56_vm1, %vm56_vm1  ;;  %s281_s21 = smov [#allocation8]  }
  0x38   :  { %v167_v4 = vpack.c.bf16 %v54_v3, %v53_v2  ;;  %v52_v5 = vld [vmem:[#allocation2] sm:$0xff]  ;;  %v55_v6 = vld [vmem:[#allocation7] sm:$0xff]  ;;  %s143_s2 = sshll.u32 %s281_s21, 4  ;;  %s144_s2 = int_to_ptr.vmem [resolvable:$true] %s143_s2 }
  0x39   :  { %s245_s22 = scalar_lea.vmem %s144_s2, 128  ;;  %p250_p11 = scmp.lt.s32.totalorder %s144_s2, %s144_s2 }
  0x3a   :  { %169 = vmatpush3.bf16.xpose.msk.msra.mxu0 %vm168_vm2, %v167_v4  ;;  %p246_p10 = scmp.ne.s32.totalorder %s144_s2, %s245_s22  ;;  %p251_p12 = scmp.lt.s32.totalorder %s245_s22, %s245_s22 }
  0x3c   :  { %p252_p13 = por %p251_p12, %p250_p11 }
  0x3e   :  { %p253_p0 = pnand %p252_p13, %p246_p10 }
  0x41   :  { %164 = vmatmul.mubr.msk.f32.vlgmr.msra.gmra.mrb[0].mxu0 %vm56_vm1, %v52_v5 }
 0x114   :  { %v132_v7 = vpop.f32.mrb[0].mxu0 }
 0x115   :  { %v133_v8 = vadd.f32 %v132_v7, %v55_v6  ;;  %v165_v9 = vpop.f32.mrb[1].mxu0 }
 0x117   :  { %136 = vst.msk [vmem:[#allocation8] sm:$0xff] %vm56_vm1, %v133_v8 }
 0x118   :  { %256 = shalt.err (!%p253_p0)
}
 0x119   :  { %s257_s25 = scalar_lea.hbm %s353_s3, 128 }
 0x11a   :  { %p258_p1 = scmp.ne.s32.totalorder %s353_s3, %s257_s25  ;;  %p261_p2 = scmp.lt.u32.totalorder %s257_s25, %s353_s3 }
 0x11c   :  { %p263_p3 = pnand %p261_p2, %p258_p1 }
 0x11e   :  { %266 = shalt.err (!%p263_p3)
}
 0x11f   :  { %146 = dma.vmem_to_hbm [thread:$0]  %s144_s2, 128, %s353_s3, [#allocation4]  }
 0x120   :  { %271 = dma.done.wait [#allocation4], 128  }
 0x121   :  { %272 = vsyncadd [#allocation4], 4294967168 }
 0x122   :  { %150 = vsyncpa [#allocation3], 1 }
 0x123   :  { %151 = vsyncpa [#allocation6], 1 }
 0x124   :  { %152 = vsyncpa [#allocation4], 1 }

</bundles_post_ra>
